<compile_context>
chip_gen: v5e
topology: v5e:2x2
jax: 0.10.0
libtpu: 0.0.40
codegen_flags: <defaults>
</compile_context>

<pallas_src>
import functools

import jax
import jax.numpy as jnp
from jax.experimental import pallas as pl
from jax.experimental.pallas import tpu as pltpu


def _addcoords_kernel(x_ref, o_ref, *, C, H, W, n_extra, ts, with_r):
    # x_ref: (1, C, TS) block of the flattened input; o_ref: (1, C_out, TS).
    # 1) Pass-through copy of the original channels (single contiguous store).
    o_ref[0, pl.ds(0, C), :] = x_ref[0, :, :].astype(o_ref.dtype)

    # 2) Coordinate channels for this spatial tile.
    #    flat = global flattened spatial index; row i = flat // W, col j = flat % W.
    #    The divmod is done in f32 with a +0.5 safety margin: exact for
    #    H*W up to a few million pixels (any realistic CoordConv feature map),
    #    and avoids relying on vector integer division support.
    k = jax.lax.broadcasted_iota(jnp.int32, (1, ts), 1)
    flat = (k + pl.program_id(1) * ts).astype(jnp.float32)
    i = jnp.floor((flat + 0.5) * jnp.float32(1.0 / W))   # row index (along H)
    j = flat - i * jnp.float32(W)                        # col index (along W)

    # Compile-time constant scales (H==1 / W==1 yields nan, matching torch 0/0).
    sx = 2.0 / (H - 1) if H > 1 else float("nan")
    sy = 2.0 / (W - 1) if W > 1 else float("nan")
    xx = i * jnp.float32(sx) - 1.0
    yy = j * jnp.float32(sy) - 1.0

    if with_r:
        rr = jnp.sqrt((xx - 0.5) ** 2 + (yy - 0.5) ** 2)
        extra = jnp.concatenate([xx, yy, rr], axis=0)    # (3, TS)
    else:
        extra = jnp.concatenate([xx, yy], axis=0)        # (2, TS)

    # Single contiguous store for all coordinate channels.
    o_ref[0, pl.ds(C, n_extra), :] = extra.astype(o_ref.dtype)


def _pick_spatial_tile(S, C, C_out, itemsize, B, budget_bytes=8 << 20):
    """Largest multiple-of-128 divisor of S (or S itself) within the VMEM budget."""
    ts = S

    def step_bytes(t):
        # in-block + out-block, double-buffered by the Pallas pipeline.
        return 2 * (C + C_out) * t * itemsize

    while step_bytes(ts) > budget_bytes and ts % 256 == 0:
        ts //= 2
    # Give v7x's two TensorCores at least two parallel grid steps when possible.
    if B * (S // ts) < 2 and ts % 256 == 0:
        ts //= 2
    return ts


def addcoords360(x: jax.Array, with_r: bool = False) -> jax.Array:
    """Pallas implementation of AddCoords360.forward.

    x: (B, C, H, W) NCHW.  Returns (B, C + 2 (+1 if with_r), H, W).
    """
    B, C, H, W = x.shape
    n_extra = 3 if with_r else 2
    C_out = C + n_extra
    S = H * W

    x2 = x.reshape(B, C, S)  # free reshape -> lane-dense last dim
    itemsize = jnp.dtype(x.dtype).itemsize
    ts = _pick_spatial_tile(S, C, C_out, itemsize, B)
    n_s = S // ts

    kernel = functools.partial(
        _addcoords_kernel, C=C, H=H, W=W, n_extra=n_extra, ts=ts, with_r=with_r)

    out2 = pl.pallas_call(
        kernel,
        out_shape=jax.ShapeDtypeStruct((B, C_out, S), x.dtype),
        grid_spec=pltpu.PrefetchScalarGridSpec(
            num_scalar_prefetch=0,
            grid=(B, n_s),
            in_specs=[pl.BlockSpec((1, C, ts), lambda b, s: (b, 0, s))],
            out_specs=pl.BlockSpec((1, C_out, ts), lambda b, s: (b, 0, s)),
        ),
        compiler_params=pltpu.CompilerParams(
            dimension_semantics=("parallel", "parallel"),
            vmem_limit_bytes=32 * 1024 * 1024,
        ),
    )(x2)
    return out2.reshape(B, C_out, H, W)


def _reference_addcoords360(x: jax.Array, with_r: bool = False) -> jax.Array:
    """Plain-JAX reference mirroring the PyTorch forward exactly."""
    B, C, H, W = x.shape  # H = x_dim, W = y_dim
    xx = jnp.broadcast_to(jnp.arange(H, dtype=jnp.float32)[:, None], (H, W))
    yy = jnp.broadcast_to(jnp.arange(W, dtype=jnp.float32)[None, :], (H, W))
    xx = xx / (H - 1) * 2.0 - 1.0
    yy = yy / (W - 1) * 2.0 - 1.0
    xx_c = jnp.broadcast_to(xx[None, None], (B, 1, H, W)).astype(x.dtype)
    yy_c = jnp.broadcast_to(yy[None, None], (B, 1, H, W)).astype(x.dtype)
    parts = [x, xx_c, yy_c]
    if with_r:
        rr = jnp.sqrt((xx_c - 0.5) ** 2 + (yy_c - 0.5) ** 2)
        parts.append(rr)
    return jnp.concatenate(parts, axis=1)


if __name__ == "__main__":
    key = jax.random.PRNGKey(0)
    B, C, H, W = 2, 4, 16, 16  # batch, channels, x_dim, y_dim
    x = jax.random.normal(key, (B, C, H, W), dtype=jnp.float32)

    # with_r = False (module default)
    out = jax.block_until_ready(addcoords360(x, with_r=False))
    ref = _reference_addcoords360(x, with_r=False)
    assert out.shape == (B, C + 2, H, W), out.shape
    assert jnp.allclose(out, ref, atol=1e-5), "mismatch (with_r=False)"

    # with_r = True path too
    out_r = jax.block_until_ready(addcoords360(x, with_r=True))
    ref_r = _reference_addcoords360(x, with_r=True)
    assert out_r.shape == (B, C + 3, H, W), out_r.shape
    assert jnp.allclose(out_r, ref_r, atol=1e-5), "mismatch (with_r=True)"

    print("KERNEL_OK")
</pallas_src>

<mosaic_0001>
module attributes {stable_mosaic.version = 11 : i64} {
  func.func @_addcoords_kernel(%arg0: i32, %arg1: i32, %arg2: memref<1x4x256xf32, #tpu.memory_space<vmem>>, %arg3: memref<1x6x256xf32, #tpu.memory_space<vmem>>) attributes {dimension_semantics = [#tpu.dimension_semantics<parallel>, #tpu.dimension_semantics<parallel>], iteration_bounds = array<i64: 2, 1>, scalar_prefetch = 0 : i64, scratch_operands = 0 : i64, tpu.core_type = #tpu.core_type<tc>, window_params = [{transform_indices = @transform_0, window_bounds = array<i64: 1, 4, 256>}, {transform_indices = @transform_1, window_bounds = array<i64: 1, 6, 256>}]} {
    %c0 = arith.constant 0 : index
    %c0_0 = arith.constant 0 : index
    %c0_1 = arith.constant 0 : index
    %0 = vector.load %arg2[%c0, %c0_0, %c0_1] : memref<1x4x256xf32, #tpu.memory_space<vmem>>, vector<1x4x256xf32>
    %1 = vector.shape_cast %0 : vector<1x4x256xf32> to vector<4x256xf32>
    %c0_2 = arith.constant 0 : index
    %c0_3 = arith.constant 0 : index
    %c0_4 = arith.constant 0 : index
    %2 = vector.load %arg3[%c0_2, %c0_3, %c0_4] : memref<1x6x256xf32, #tpu.memory_space<vmem>>, vector<1x4x256xf32>
    %3 = vector.shape_cast %2 : vector<1x4x256xf32> to vector<4x256xf32>
    %4 = vector.shape_cast %1 : vector<4x256xf32> to vector<1x4x256xf32>
    tpu.vector_store %arg3[%c0_2, %c0_3, %c0_4], %4 {strides = array<i32>} : memref<1x6x256xf32, #tpu.memory_space<vmem>>, vector<1x4x256xf32>,
    %5 = tpu.iota {dimensions = array<i32: 1>} : vector<1x256xi32>
    %c256_i32 = arith.constant 256 : i32
    %6 = arith.muli %arg1, %c256_i32 : i32
    %7 = vector.broadcast %6 : i32 to vector<1x256xi32>
    %8 = arith.addi %5, %7 : vector<1x256xi32>
    %9 = arith.sitofp %8 : vector<1x256xi32> to vector<1x256xf32>
    %cst = arith.constant 5.000000e-01 : f32
    %10 = vector.broadcast %cst : f32 to vector<1x256xf32>
    %11 = arith.addf %9, %10 : vector<1x256xf32>
    %cst_5 = arith.constant 6.250000e-02 : f32
    %12 = vector.broadcast %cst_5 : f32 to vector<1x256xf32>
    %13 = arith.mulf %11, %12 : vector<1x256xf32>
    %14 = math.floor %13 : vector<1x256xf32>
    %cst_6 = arith.constant 1.600000e+01 : f32
    %15 = vector.broadcast %cst_6 : f32 to vector<1x256xf32>
    %16 = arith.mulf %14, %15 : vector<1x256xf32>
    %17 = arith.subf %9, %16 : vector<1x256xf32>
    %cst_7 = arith.constant 0.13333334 : f32
    %18 = vector.broadcast %cst_7 : f32 to vector<1x256xf32>
    %19 = arith.mulf %14, %18 : vector<1x256xf32>
    %cst_8 = arith.constant 1.000000e+00 : f32
    %20 = vector.broadcast %cst_8 : f32 to vector<1x256xf32>
    %21 = arith.subf %19, %20 : vector<1x256xf32>
    %cst_9 = arith.constant 0.13333334 : f32
    %22 = vector.broadcast %cst_9 : f32 to vector<1x256xf32>
    %23 = arith.mulf %17, %22 : vector<1x256xf32>
    %cst_10 = arith.constant 1.000000e+00 : f32
    %24 = vector.broadcast %cst_10 : f32 to vector<1x256xf32>
    %25 = arith.subf %23, %24 : vector<1x256xf32>
    %26 = tpu.concatenate %21, %25 in 0 : vector<1x256xf32>, vector<1x256xf32> -> vector<2x256xf32>
    %c0_11 = arith.constant 0 : index
    %c4 = arith.constant 4 : index
    %c0_12 = arith.constant 0 : index
    %27 = vector.load %arg3[%c0_11, %c4, %c0_12] : memref<1x6x256xf32, #tpu.memory_space<vmem>>, vector<1x2x256xf32>
    %28 = vector.shape_cast %27 : vector<1x2x256xf32> to vector<2x256xf32>
    %29 = vector.shape_cast %26 : vector<2x256xf32> to vector<1x2x256xf32>
    tpu.vector_store %arg3[%c0_11, %c4, %c0_12], %29 {strides = array<i32>} : memref<1x6x256xf32, #tpu.memory_space<vmem>>, vector<1x2x256xf32>,
    return
  }
  func.func @transform_0(%arg0: i32, %arg1: i32) -> (i32, i32, i32) {
    %c0_i32 = arith.constant 0 : i32
    %c0_i32_0 = arith.constant 0 : i32
    return %arg0, %c0_i32, %arg1 : i32, i32, i32
  }
  func.func @transform_1(%arg0: i32, %arg1: i32) -> (i32, i32, i32) {
    %c0_i32 = arith.constant 0 : i32
    %c0_i32_0 = arith.constant 0 : i32
    return %arg0, %c0_i32, %arg1 : i32, i32, i32
  }
}

</mosaic_0001>

<bundles_post_ra>
// kernel: tpu_custom_call.1
= control target key start
LH: loop header
LB: loop body
LE: loop exit
PB: predicated region body
PF: predicated region fallthrough
CT: control target
= control target key end

     0   :  { %6 = vsyncpa [#allocation3], 0  ;;  %s561_s0 = inlined_call_operand.hbm [shape: f32[2,4,256], index: 0, kind: input, shape index: {}]   ;;  %s562_s1 = inlined_call_operand.vmem [shape: f32[2,6,256], index: 1, kind: output, shape index: {}]  }
   0x1   :  { %8 = vsyncpa [#allocation3 + $0x1], 0  ;;  %s473_s6 = smov 0   ;;  %s475_s7 = smov 0  }
   0x2   :  { %s477_s8 = smov 0   ;;  %s479_s9 = smov 0  }
   0x3   :  { %s481_s10 = smov 0   ;;  %s483_s11 = smov 0  }
   0x4 LB: > { %s307_s12 = sadd.s32 4294967295, %s461_s11   ;;  %s26_s13 = sadd.s32 1, %s457_s10  ;;  %s461_s11 = sphi %s483_s11, %s14_s11   ;;  %s457_s10 = sphi %s481_s10, %s569_s10   ;;  %s453_s9 = sphi %s479_s9, %s568_s9   ;;  %s449_s8 = sphi %s477_s8, %s567_s8   ;;  %s445_s7 = sphi %s475_s7, %s566_s7   ;;  %s441_s6 = sphi %s473_s6, %s565_s6  }
   0x5   : > { %p28_p0 = scmp.ge.s32.totalorder %s26_s13, 2  ;;  %s35_s14 = sadd.s32 1, %s449_s8 }
   0x6   : > { %p42_p1 = scmp.ne.s32.totalorder %s449_s8, %s445_s7  ;;  %p43_p2 = scmp.eq.s32.totalorder %s461_s11, 0 }
   0x7   : > { %s571_s13 = smov (%p28_p0, %s26_s13), 0  ;;  %p48_p4 = scmp.ne.s32.totalorder %s445_s7, %s441_s6 }
   0x8   : > { %p509_p3 = por %p43_p2, %p42_p1  ;;  %s30_s16 = ssub.s32 %s457_s10, %s571_s13 }
   0x9   : > { %p49_p5 = scmp.eq.s32.totalorder %s307_s12, 0  ;;  %p33_p6 = scmp.eq.s32.totalorder %s30_s16, 0 }
   0xa   : > { %p332_p8 = scmp.lt.s32.totalorder %s461_s11, 2  ;;  %s100_s19 = sand.u32 1, %s449_s8  }
   0xb   : > { %p516_p7 = por %p49_p5, %p48_p4  ;;  %s324_s20 = sshll.u32 %s457_s10, 3 }
   0xc   : > { %s522_s18 = scalar_select %p33_p6, %s449_s8, %s35_s14  }
   0xd   : > { %s311_s21 = sshll.u32 %s100_s19, 3  ;;  %s111_s24 = scalar_lea.hbm %s561_s0, %s324_s20 }
   0xe   : > { %s113_s25 = sshll.u32 %s111_s24, 4  ;;  %s104_s26 = scalar_lea.vmem [#allocation2], %s311_s21  ;;  %s114_s25 = int_to_ptr.hbm [resolvable:$true] %s113_s25 }
   0xf   : > { %s115_s27 = sshll.u32 %s104_s26, 4  ;;  %p329_p9 = pnand %p332_p8, %p509_p3  ;;  %s116_s27 = int_to_ptr.vmem [resolvable:$true] %s115_s27 }
  0x10   : > { %p314_p10 = scmp.ge.s32.totalorder %s461_s11, 1  ;;  %p120_p11 = scmp.lt.s32.totalorder %s461_s11, 3 }
  0x11   : > { %s101_s28 = scalar_lea.sflag [#allocation3], %s100_s19 }
  0x12   : > { %331 = dma.hbm_to_vmem [thread:$0]  (!%p329_p9), %s114_s25, 128, %s116_s27, %s101_s28  }
  0x13   : > { %p121_p12 = pnand %p314_p10, %p120_p11 }
  0x14   : > { %s126_s29 = sand.u32 (!%p121_p12), 1, %s445_s7  }
  0x15   : > { %124 = sbr.rel (%p121_p12) target bundleno = 53 (0x35), region = 24  ;;  %s315_s30 = sshll.u32 (!%p121_p12), %s126_s29, 3 }
  0x16   : > { %s127_s2 = scalar_lea.sflag (!%p121_p12), [#allocation3], %s126_s29  ;;  %s130_s3 = scalar_lea.vmem (!%p121_p12), [#allocation2], %s315_s30 }
  0x1a   : > { %436 = dma.done.wait (%p516_p7), %s127_s2, 128  }
  0x1b   : > { %438 = vsyncadd (%p516_p7), %s127_s2, 4294967168  ;;  %v174_v0 = vlaneseq  ;;  %p156_p13 = scmp.lt.s32.totalorder %s453_s9, 1  ;;  %v165_v6 = vld [vmem:[%s130_s3] sm:$0xff]  ;;  %vm201_vm0 = vcmask 1040384  }
  0x1c   : > { %167 = vst [vmem:[#allocation1] ss:$2 sm:$0xff] %v165_v6 }
  0x1d   : > { %v175_v1 = vand.u32 127, %v174_v0  ;;  %s573_s9 = smov (!%p156_p13, %s453_s9), 1 }
  0x1e   : > { %s325_s4 = sshll.u32 %s573_s9, 4 }
  0x1f   : > { %v181_v2 = vcvt.s32.f32 %v175_v1  ;;  %v176_v3 = vadd.s32 128, %v175_v1  ;;  %s163_s12 = scalar_lea.vmem %s562_s1, %s325_s4 }
  0x21   : > { %v183_v4 = vadd.f32 0.5, %v181_v2  ;;  %v182_v5 = vcvt.s32.f32 %v176_v3 }
  0x23   : > { %v185_v7 = vmul.f32 0.0625, %v183_v4  ;;  %v184_v8 = vadd.f32 0.5, %v182_v5  ;;  %v168_v17 = vld.sshfl [vmem:[#allocation1] sm:$0xff pattern:$0x75316420] }
  0x24   : > { %v169_v18 = vld.sshfl [vmem:[#allocation1 + $0x8] sm:$0xff pattern:$0x75316420]  ;;  %172 = vst [vmem:[%s163_s12] sm:$0xf] %v168_v17 }
  0x25   : > { %v187_v9 = vfloor.f32 %v185_v7  ;;  %v186_v10 = vmul.f32 0.0625, %v184_v8  ;;  %173 = vst [vmem:[%s163_s12 + $0x8] sm:$0xf] %v169_v18 }
  0x27   : > { %v189_v11 = vmul.f32 16.0, %v187_v9  ;;  %v193_v12 = vmul.f32 0.13333334, %v187_v9  ;;  %v188_v13 = vfloor.f32 %v186_v10 }
  0x29   : > { %v191_v14 = vsub.f32 %v181_v2, %v189_v11  ;;  %v190_v15 = vmul.f32 16.0, %v188_v13  ;;  %v194_v16 = vmul.f32 0.13333334, %v188_v13  ;;  %v318_v19 = vadd.f32 -1.0, %v193_v12 }
  0x2b   : > { %v197_v20 = vmul.f32 0.13333334, %v191_v14  ;;  %v192_v21 = vsub.f32 %v182_v5, %v190_v15  ;;  %v319_v23 = vadd.f32 -1.0, %v194_v16 }
  0x2d   : > { %v320_v22 = vadd.f32 -1.0, %v197_v20  ;;  %v198_v24 = vmul.f32 0.13333334, %v192_v21 }
  0x2f   : > { %v202_v25 = vsel %vm201_vm0, %v318_v19, %v320_v22  ;;  %v321_v26 = vadd.f32 -1.0, %v198_v24 }
  0x30   : > { %v206_v27 = vrot.slane %v202_v25, 4 }
  0x31   : > { %v203_v28 = vsel %vm201_vm0, %v319_v23, %v321_v26 }
  0x32   : > { %210 = vst [vmem:[%s163_s12] sm:$0x30] %v206_v27  ;;  %v207_v29 = vrot.slane %v203_v28, 4 }
  0x34   : > { %211 = vst [vmem:[%s163_s12 + $0x8] sm:$0x30] %v207_v29 }
  0x35 PF: > { %s14_s11 = sadd.s32 1, %s461_s11   ;;  %s565_s6 = smov %s445_s7 }
  0x36   : > { %p11_p0 = scmp.ge.s32.totalorder %s14_s11, 4   ;;  %s566_s7 = smov %s449_s8 }
  0x37   : > { %s567_s8 = smov %s522_s18  ;;  %s568_s9 = smov %s457_s10 }
  0x38   : > { %s569_s10 = smov %s571_s13  ;;  %13 = sbr.rel (!%p11_p0) target bundleno = 4 (0x4), region = 64 }
  0x3d   :  { %242 = vsyncpa [#allocation3], 1 }
  0x3e   :  { %244 = vsyncpa [#allocation3 + $0x1], 1 }

</bundles_post_ra>
